<compile_context>
chip_gen: v7x
topology: tpu7x:2x2x1
jax: 0.10.0
libtpu: 0.0.40
codegen_flags: <defaults>
</compile_context>

<pallas_src>
import functools
import math

import jax
import jax.numpy as jnp
from jax import lax
from jax.experimental import pallas as pl
from jax.experimental.pallas import tpu as pltpu


# ----------------------------------------------------------------------------
# Fused kernel: normalize(adj) -> relu(adj_n @ (x W1) + b1) -> adj_n @ (h W2) + b2
# ----------------------------------------------------------------------------
def _gcn_fused_kernel(adj_ref, x_ref, w1_ref, b1_ref, w2_ref, b2_ref, out_ref,
                      *, cast_bf16):
    Bb, K, Cin = x_ref.shape
    H = w1_ref.shape[1]
    Cout = w2_ref.shape[1]

    # ---- symmetric normalization  D^{-1/2} (A + I) D^{-1/2}  (stays in vregs)
    row = lax.broadcasted_iota(jnp.int32, (K, K), 0)
    col = lax.broadcasted_iota(jnp.int32, (K, K), 1)
    eye = jnp.where(row == col, 1.0, 0.0).astype(jnp.float32)
    a = adj_ref[...].astype(jnp.float32) + eye
    rowsum = jnp.sum(a, axis=1, keepdims=True)           # (K, 1)
    r = lax.rsqrt(rowsum)                                # EUP op, replaces pow(-0.5)
    r = jnp.where(jnp.isinf(r), 0.0, r)                  # inf -> 0 like the reference
    adj_n = (r * a) * jnp.transpose(r)                   # (K, K) f32

    # ---- block-diagonal adjacency: one MXU push covers the whole batch block.
    # Built with sublane/lane concatenations (no gathers, no minor-dim reshape).
    if Bb > 1:
        zero = jnp.zeros((K, K), jnp.float32)
        brows = [
            jnp.concatenate([adj_n if j == i else zero for j in range(Bb)], axis=1)
            for i in range(Bb)
        ]
        adj_bd = jnp.concatenate(brows, axis=0)           # (Bb*K, Bb*K)
    else:
        adj_bd = adj_n

    mm_dtype = jnp.bfloat16 if cast_bf16 else jnp.float32
    adj_mm = adj_bd.astype(mm_dtype)
    w1 = w1_ref[...].astype(mm_dtype)
    w2 = w2_ref[...].astype(mm_dtype)

    # ---- layer 1: support = X @ W1, batch folded into M (single MXU push),
    # then one block-diagonal adjacency matmul, bias added once, ReLU.
    x_flat = x_ref[...].reshape(Bb * K, Cin).astype(mm_dtype)
    s1 = jnp.dot(x_flat, w1, preferred_element_type=jnp.float32)     # (Bb*K, H)
    h = jnp.dot(adj_mm, s1.astype(mm_dtype),
                preferred_element_type=jnp.float32) + b1_ref[...]
    h = jnp.maximum(h, 0.0)

    # F.dropout with p = 0 is the identity; nothing to do.

    # ---- layer 2: same structure, single lane-dense full-block output store.
    s2 = jnp.dot(h.astype(mm_dtype), w2, preferred_element_type=jnp.float32)
    o = jnp.dot(adj_mm, s2.astype(mm_dtype),
                preferred_element_type=jnp.float32) + b2_ref[...]     # (Bb*K, Cout)

    out_ref[...] = o.reshape(Bb, K, Cout).astype(out_ref.dtype)


def _pick_batch_block(B, K, max_rows=128):
    """Largest divisor of B whose row count Bb*K stays within one MXU-ish tile."""
    best = 1
    for d in range(1, B + 1):
        if B % d == 0 and d * K <= max_rows:
            best = d
    return best


def gcn_forward(x, adj, params, *, batch_block=None):
    B, K, Cin = x.shape
    H = params["w1_t"].shape[1]
    Cout = params["w2_t"].shape[1]
    b1 = params["b1"].reshape(1, H)
    b2 = params["b2"].reshape(1, Cout)

    Bb = batch_block if batch_block is not None else _pick_batch_block(B, K)
    assert B % Bb == 0, "batch block must divide the batch"
    grid = (B // Bb,)

    # Cast the matmul operands to bf16 (keeping f32 accumulation) only once the
    # feature dims are big enough to be MXU-bound; at small shapes f32 is noise.
    cast_bf16 = max(Cin, H, Cout) >= 256

    kernel = functools.partial(_gcn_fused_kernel, cast_bf16=cast_bf16)

    # TODO(synk): for large node counts K, the (K, K) adjacency must be tiled
    # over a contraction grid axis ("arbitrary") with an f32 VMEM accumulator
    # and a D^{-1/2} prologue pass; budget against v7x's 64 MiB VMEM (tiles
    # that fit v5e/v6e's 128 MiB will OOM there).  A single resident block is
    # fine at these sizes.
    return pl.pallas_call(
        kernel,
        out_shape=jax.ShapeDtypeStruct((B, K, Cout), x.dtype),
        grid=grid,
        in_specs=[
            pl.BlockSpec((K, K), lambda i: (0, 0)),            # adj      (resident)
            pl.BlockSpec((Bb, K, Cin), lambda i: (i, 0, 0)),   # x        (streams)
            pl.BlockSpec((Cin, H), lambda i: (0, 0)),          # W1^T     (resident)
            pl.BlockSpec((1, H), lambda i: (0, 0)),            # b1       (resident)
            pl.BlockSpec((H, Cout), lambda i: (0, 0)),         # W2^T     (resident)
            pl.BlockSpec((1, Cout), lambda i: (0, 0)),         # b2       (resident)
        ],
        out_specs=pl.BlockSpec((Bb, K, Cout), lambda i: (i, 0, 0)),
        compiler_params=pltpu.CompilerParams(
            dimension_semantics=("parallel",)),   # shard batch across v7x's 2 TCs
    )(adj, x, params["w1_t"], b1, params["w2_t"], b2)


# ----------------------------------------------------------------------------
# Params / reference
# ----------------------------------------------------------------------------
def init_params(key, input_size, hidden_size, output_size):
    k1, k2, k3, k4 = jax.random.split(key, 4)
    bound1 = 1.0 / math.sqrt(input_size)
    bound2 = 1.0 / math.sqrt(hidden_size)
    w1 = jax.random.uniform(k1, (hidden_size, input_size), jnp.float32,
                            -bound1, bound1)
    w2 = jax.random.uniform(k2, (output_size, hidden_size), jnp.float32,
                            -bound2, bound2)
    b1 = jax.random.uniform(k3, (hidden_size,), jnp.float32, -0.1, 0.1)
    b2 = jax.random.uniform(k4, (output_size,), jnp.float32, -0.1, 0.1)
    return {"w1_t": w1.T, "b1": b1, "w2_t": w2.T, "b2": b2}


def _reference_forward(x, adj, params):
    # pure-JAX reference for a correctness sanity check
    K = adj.shape[0]
    a = adj + jnp.eye(K, dtype=adj.dtype)
    r = jnp.sum(a, axis=1) ** -0.5
    r = jnp.where(jnp.isinf(r), 0.0, r)
    adj_n = (r[:, None] * a) * r[None, :]
    h = jnp.einsum("kj,bjc->bkc", adj_n, x @ params["w1_t"]) + params["b1"]
    h = jnp.maximum(h, 0.0)
    out = jnp.einsum("kj,bjc->bkc", adj_n, h @ params["w2_t"]) + params["b2"]
    return out


if __name__ == "__main__":
    key = jax.random.PRNGKey(0)
    kx, kadj, kp = jax.random.split(key, 3)

    B, K = 2, 8                      # batch, number of graph nodes
    input_size, hidden_size, output_size = 16, 32, 16

    x = jax.random.normal(kx, (B, K, input_size), jnp.float32)
    adj = (jax.random.uniform(kadj, (K, K), jnp.float32) > 0.5).astype(jnp.float32)

    params = init_params(kp, input_size, hidden_size, output_size)

    out = gcn_forward(x, adj, params)
    out = jax.block_until_ready(out)

    ref = _reference_forward(x, adj, params)
    assert out.shape == (B, K, output_size)
    assert jnp.allclose(out, ref, atol=1e-4, rtol=1e-4), "mismatch vs JAX reference"

    print("KERNEL_OK")
</pallas_src>

<mosaic_0001>
module attributes {stable_mosaic.version = 11 : i64} {
  func.func @_gcn_fused_kernel(%arg0: i32, %arg1: memref<8x8xf32, #tpu.memory_space<vmem>>, %arg2: memref<2x8x16xf32, #tpu.memory_space<vmem>>, %arg3: memref<16x32xf32, #tpu.memory_space<vmem>>, %arg4: memref<1x32xf32, #tpu.memory_space<vmem>>, %arg5: memref<32x16xf32, #tpu.memory_space<vmem>>, %arg6: memref<1x16xf32, #tpu.memory_space<vmem>>, %arg7: memref<2x8x16xf32, #tpu.memory_space<vmem>>) attributes {dimension_semantics = [#tpu.dimension_semantics<parallel>], iteration_bounds = array<i64: 1>, scalar_prefetch = 0 : i64, scratch_operands = 0 : i64, tpu.core_type = #tpu.core_type<tc>, window_params = [{pipeline_mode = #tpu.pipeline_mode<synchronous>, transform_indices = @transform_0, window_bounds = array<i64: 8, 8>}, {transform_indices = @transform_1, window_bounds = array<i64: 2, 8, 16>}, {pipeline_mode = #tpu.pipeline_mode<synchronous>, transform_indices = @transform_2, window_bounds = array<i64: 16, 32>}, {pipeline_mode = #tpu.pipeline_mode<synchronous>, transform_indices = @transform_3, window_bounds = array<i64: 1, 32>}, {pipeline_mode = #tpu.pipeline_mode<synchronous>, transform_indices = @transform_4, window_bounds = array<i64: 32, 16>}, {pipeline_mode = #tpu.pipeline_mode<synchronous>, transform_indices = @transform_5, window_bounds = array<i64: 1, 16>}, {transform_indices = @transform_6, window_bounds = array<i64: 2, 8, 16>}]} {
    %0 = tpu.iota {dimensions = array<i32: 0>} : vector<8x8xi32>
    %1 = tpu.iota {dimensions = array<i32: 1>} : vector<8x8xi32>
    %2 = arith.cmpi eq, %0, %1 : vector<8x8xi32>
    %cst = arith.constant 1.000000e+00 : f32
    %cst_0 = arith.constant 0.000000e+00 : f32
    %3 = vector.broadcast %cst : f32 to vector<8x8xf32>
    %4 = vector.broadcast %cst_0 : f32 to vector<8x8xf32>
    %5 = arith.select %2, %3, %4 : vector<8x8xi1>, vector<8x8xf32>
    %c0 = arith.constant 0 : index
    %c0_1 = arith.constant 0 : index
    %6 = vector.load %arg1[%c0, %c0_1] : memref<8x8xf32, #tpu.memory_space<vmem>>, vector<8x8xf32>
    %7 = arith.addf %6, %5 : vector<8x8xf32>
    %cst_2 = arith.constant dense<0.000000e+00> : vector<8xf32>
    %8 = vector.multi_reduction <add>, %7, %cst_2 [1] : vector<8x8xf32> to vector<8xf32>
    %9 = vector.shape_cast %8 : vector<8xf32> to vector<8x1xf32>
    %10 = math.rsqrt %9 : vector<8x1xf32>
    %11 = math.absf %10 : vector<8x1xf32>
    %cst_3 = arith.constant 0x7F800000 : f32
    %12 = vector.broadcast %cst_3 : f32 to vector<8x1xf32>
    %13 = arith.cmpf oeq, %11, %12 : vector<8x1xf32>
    %cst_4 = arith.constant 0.000000e+00 : f32
    %14 = vector.broadcast %cst_4 : f32 to vector<8x1xf32>
    %15 = arith.select %13, %14, %10 : vector<8x1xi1>, vector<8x1xf32>
    %16 = vector.broadcast %15 : vector<8x1xf32> to vector<8x8xf32>
    %17 = arith.mulf %16, %7 : vector<8x8xf32>
    %18 = tpu.transpose %15, [1, 0] : vector<8x1xf32> -> vector<1x8xf32>
    %19 = vector.broadcast %18 : vector<1x8xf32> to vector<8x8xf32>
    %20 = arith.mulf %17, %19 : vector<8x8xf32>
    %cst_5 = arith.constant 0.000000e+00 : f32
    %21 = vector.broadcast %cst_5 : f32 to vector<8x8xf32>
    %22 = tpu.concatenate %20, %21 in 1 : vector<8x8xf32>, vector<8x8xf32> -> vector<8x16xf32>
    %23 = tpu.concatenate %21, %20 in 1 : vector<8x8xf32>, vector<8x8xf32> -> vector<8x16xf32>
    %24 = tpu.concatenate %22, %23 in 0 : vector<8x16xf32>, vector<8x16xf32> -> vector<16x16xf32>
    %c0_6 = arith.constant 0 : index
    %c0_7 = arith.constant 0 : index
    %25 = vector.load %arg3[%c0_6, %c0_7] : memref<16x32xf32, #tpu.memory_space<vmem>>, vector<16x32xf32>
    %c0_8 = arith.constant 0 : index
    %c0_9 = arith.constant 0 : index
    %26 = vector.load %arg5[%c0_8, %c0_9] : memref<32x16xf32, #tpu.memory_space<vmem>>, vector<32x16xf32>
    %c0_10 = arith.constant 0 : index
    %c0_11 = arith.constant 0 : index
    %c0_12 = arith.constant 0 : index
    %27 = vector.load %arg2[%c0_10, %c0_11, %c0_12] : memref<2x8x16xf32, #tpu.memory_space<vmem>>, vector<2x8x16xf32>
    %28 = vector.shape_cast %27 : vector<2x8x16xf32> to vector<16x16xf32>
    %cst_13 = arith.constant dense<0.000000e+00> : vector<16x32xf32>
    %29 = tpu.matmul %28, %25, %cst_13 {dimension_numbers = #tpu.dot_dimension_numbers<[1], [0], [0], [1], [0, 0, 1, 1], [], []>} : vector<16x16xf32>, vector<16x32xf32>, vector<16x32xf32> -> vector<16x32xf32>
    %cst_14 = arith.constant dense<0.000000e+00> : vector<16x32xf32>
    %30 = tpu.matmul %24, %29, %cst_14 {dimension_numbers = #tpu.dot_dimension_numbers<[1], [0], [0], [1], [0, 0, 1, 1], [], []>} : vector<16x16xf32>, vector<16x32xf32>, vector<16x32xf32> -> vector<16x32xf32>
    %c0_15 = arith.constant 0 : index
    %c0_16 = arith.constant 0 : index
    %31 = vector.load %arg4[%c0_15, %c0_16] : memref<1x32xf32, #tpu.memory_space<vmem>>, vector<1x32xf32>
    %32 = vector.broadcast %31 : vector<1x32xf32> to vector<16x32xf32>
    %33 = arith.addf %30, %32 : vector<16x32xf32>
    %cst_17 = arith.constant 0.000000e+00 : f32
    %34 = vector.broadcast %cst_17 : f32 to vector<16x32xf32>
    %35 = arith.maximumf %33, %34 : vector<16x32xf32>
    %cst_18 = arith.constant dense<0.000000e+00> : vector<16x16xf32>
    %36 = tpu.matmul %35, %26, %cst_18 {dimension_numbers = #tpu.dot_dimension_numbers<[1], [0], [0], [1], [0, 0, 1, 1], [], []>} : vector<16x32xf32>, vector<32x16xf32>, vector<16x16xf32> -> vector<16x16xf32>
    %cst_19 = arith.constant dense<0.000000e+00> : vector<16x16xf32>
    %37 = tpu.matmul %24, %36, %cst_19 {dimension_numbers = #tpu.dot_dimension_numbers<[1], [0], [0], [1], [0, 0, 1, 1], [], []>} : vector<16x16xf32>, vector<16x16xf32>, vector<16x16xf32> -> vector<16x16xf32>
    %c0_20 = arith.constant 0 : index
    %c0_21 = arith.constant 0 : index
    %38 = vector.load %arg6[%c0_20, %c0_21] : memref<1x16xf32, #tpu.memory_space<vmem>>, vector<1x16xf32>
    %39 = vector.broadcast %38 : vector<1x16xf32> to vector<16x16xf32>
    %40 = arith.addf %37, %39 : vector<16x16xf32>
    %41 = vector.shape_cast %40 : vector<16x16xf32> to vector<2x8x16xf32>
    %c0_22 = arith.constant 0 : index
    %c0_23 = arith.constant 0 : index
    %c0_24 = arith.constant 0 : index
    %42 = vector.load %arg7[%c0_22, %c0_23, %c0_24] : memref<2x8x16xf32, #tpu.memory_space<vmem>>, vector<2x8x16xf32>
    tpu.vector_store %arg7[%c0_22, %c0_23, %c0_24], %41 {strides = array<i32>} : memref<2x8x16xf32, #tpu.memory_space<vmem>>, vector<2x8x16xf32>,
    return
  }
  func.func @transform_0(%arg0: i32) -> (i32, i32) {
    %c0_i32 = arith.constant 0 : i32
    %c0_i32_0 = arith.constant 0 : i32
    %c0_i32_1 = arith.constant 0 : i32
    return %c0_i32, %c0_i32_0 : i32, i32
  }
  func.func @transform_1(%arg0: i32) -> (i32, i32, i32) {
    %c0_i32 = arith.constant 0 : i32
    %c0_i32_0 = arith.constant 0 : i32
    %c0_i32_1 = arith.constant 0 : i32
    return %arg0, %c0_i32, %c0_i32_0 : i32, i32, i32
  }
  func.func @transform_2(%arg0: i32) -> (i32, i32) {
    %c0_i32 = arith.constant 0 : i32
    %c0_i32_0 = arith.constant 0 : i32
    %c0_i32_1 = arith.constant 0 : i32
    return %c0_i32, %c0_i32_0 : i32, i32
  }
  func.func @transform_3(%arg0: i32) -> (i32, i32) {
    %c0_i32 = arith.constant 0 : i32
    %c0_i32_0 = arith.constant 0 : i32
    %c0_i32_1 = arith.constant 0 : i32
    return %c0_i32, %c0_i32_0 : i32, i32
  }
  func.func @transform_4(%arg0: i32) -> (i32, i32) {
    %c0_i32 = arith.constant 0 : i32
    %c0_i32_0 = arith.constant 0 : i32
    %c0_i32_1 = arith.constant 0 : i32
    return %c0_i32, %c0_i32_0 : i32, i32
  }
  func.func @transform_5(%arg0: i32) -> (i32, i32) {
    %c0_i32 = arith.constant 0 : i32
    %c0_i32_0 = arith.constant 0 : i32
    %c0_i32_1 = arith.constant 0 : i32
    return %c0_i32, %c0_i32_0 : i32, i32
  }
  func.func @transform_6(%arg0: i32) -> (i32, i32, i32) {
    %c0_i32 = arith.constant 0 : i32
    %c0_i32_0 = arith.constant 0 : i32
    %c0_i32_1 = arith.constant 0 : i32
    return %arg0, %c0_i32, %c0_i32_0 : i32, i32, i32
  }
}

</mosaic_0001>

<bundles_post_ra>
// kernel: tpu_custom_call.1
= control target key start
LH: loop header
LB: loop body
LE: loop exit
PB: predicated region body
PF: predicated region fallthrough
CT: control target
= control target key end

     0   :  { %v24_v0 = vlaneseq  ;;  %s653_s0 = inlined_call_operand.vmem [shape: f32[8,8], index: 0, kind: input, shape index: {}]   ;;  %s654_s1 = inlined_call_operand.vmem [shape: f32[2,8,16], index: 1, kind: input, shape index: {}]   ;;  %s655_s2 = inlined_call_operand.vmem [shape: f32[16,32], index: 2, kind: input, shape index: {}]   ;;  %s656_s3 = inlined_call_operand.vmem [shape: f32[1,32], index: 3, kind: input, shape index: {}]   ;;  %s657_s4 = inlined_call_operand.vmem [shape: f32[32,16], index: 4, kind: input, shape index: {}]   ;;  %s658_s5 = inlined_call_operand.vmem [shape: f32[1,16], index: 5, kind: input, shape index: {}]   ;;  %s659_s6 = inlined_call_operand.hbm [shape: f32[2,8,16], index: 6, kind: output, shape index: {}]  }
   0x1   :  { %11 = vsyncpa [#allocation3], 0  ;;  %v30_v3 = vld [vmem:[%s653_s0] sm:$0xff]  ;;  %v556_v4 = vmov 0.0   ;;  %vm32_vm1 = vcmask 64512   ;;  %v85_v9 = vld [vmem:[%s655_s2 + $0x8] sm:$0xff] }
   0x2   :  { %v25_v1 = vshrl.u32 %v24_v0, 7  ;;  %v27_v2 = vand.u32 127, %v24_v0  ;;  %v84_v8 = vld [vmem:[%s655_s2] sm:$0xff]  ;;  %vm92_vm2 = vcmask 130048   ;;  %v91_v12 = vld [vmem:[%s654_s1 + $0x8] sm:$0xff]  ;;  %s557_s8 = smov 8  }
   0x3   :  { %v90_v10 = vld [vmem:[%s654_s1] sm:$0xff]  ;;  %v506_v11 = vpack.c.bf16 %v85_v9, %v84_v8  ;;  %v87_v21 = vld [vmem:[%s657_s4 + $0x8] sm:$0xff]  ;;  %v88_v31 = vld [vmem:[%s657_s4 + $0x10] sm:$0xff]  ;;  %vm264_vm4 = vcmask 261120  }
   0x4   :  { %vm28_vm0 = vcmp.eq.s32.totalorder %v25_v1, %v27_v2  ;;  %478 = vmatprep.mubr.msk.f32.mxu0 %vm92_vm2, %v90_v10  ;;  %v86_v20 = vld [vmem:[%s657_s4] sm:$0xff]  ;;  %v75_v23 = vsub.s32 0, %v25_v1  ;;  %v89_v32 = vld [vmem:[%s657_s4 + $0x18] sm:$0xff] }
   0x5   :  { %v29_v5 = vsel %vm28_vm0, 1.0, %v556_v4  ;;  %507 = vmatprep.subr.bf16.mxu0 %v506_v11  ;;  %v514_v22 = vpack.c.bf16 %v87_v21, %v86_v20  ;;  %v518_v33 = vpack.c.bf16 %v89_v32, %v88_v31  ;;  %v448_v34 = vld [vmem:[%s656_s3] ss:$0 sm:$0xff]  ;;  %s558_s3 = smov [#allocation2]  }
   0x6   :  { %v31_v6 = vadd.f32 %v30_v3, %v29_v5  ;;  %509 = vmatpush3.bf16.msra.mxu0 %v506_v11  ;;  %v453_v44 = vld [vmem:[%s658_s5] ss:$0 sm:$0xff]  ;;  %s435_s16 = sshll.u32 %s558_s3, 4  ;;  %s436_s16 = int_to_ptr.vmem [resolvable:$true] %s435_s16 }
   0x7   :  { %515 = vmatprep.subr.bf16.mxu0 %v514_v22  ;;  %s532_s17 = scalar_lea.vmem %s436_s16, 256  ;;  %p537_p1 = scmp.lt.s32.totalorder %s436_s16, %s436_s16 }
   0x8   :  { %v33_v7 = vsel %vm32_vm1, %v31_v6, 0.0  ;;  %p533_p0 = scmp.ne.s32.totalorder %s436_s16, %s532_s17  ;;  %p538_p2 = scmp.lt.s32.totalorder %s532_s17, %s532_s17 }
   0x9   :  { %34 = vadd.xlane.f32.xlu0 %v33_v7  ;;  %479 = vmatmul.mubr.msk.f32.vlgmr.msra.gmra.mrb[0].mxu0 %vm92_vm2, %v91_v12 }
   0xa   :  { %517 = vmatpush3.bf16.msra.mxu0 %v514_v22  ;;  %p539_p3 = por %p538_p2, %p537_p1 }
   0xb   :  { %519 = vmatprep.subr.bf16.mxu0 %v518_v33 }
   0xc   :  { %p540_p4 = pnand %p539_p3, %p533_p0 }
   0xe   :  { %521 = vmatpush3.bf16.msra.mxu0 %v518_v33 }
  0x96   :  { %v35_v13 = vpop.xlane.xlu0 %34 }
  0x97   :  { %530 = vrsqrt.f32 %v35_v13 }
  0xa1   :  { %v531_v14 = vpop.eup %530 }
  0xa2   :  { %v37_v15 = vand.u32 2147483647, %v531_v14 }
  0xa4   :  { %vm38_vm3 = vcmp.eq.f32.partialorder %v37_v15, inf }
  0xa5   :  { %v39_v16 = vsel %vm38_vm3, 0.0, %v531_v14 }
  0xa6   :  { %41 = vxpose.xlu0.b32.start.end [1/1] (short) (narrow) %v39_v16, 8  ;;  %v40_v25 = vmul.f32 %v39_v16, %v31_v6 }
  0xdc   :  { %v480_v17 = vpop.f32.mrb[0].mxu0 }
  0xdd   :  { %v165_v18 = vpop.f32.mrb[1].mxu0 }
  0xde   :  { %v510_v19 = vpack.c.bf16 %v480_v17, %v165_v18 }
  0xe0   :  { %511 = vmatprep.subr.bf16.mxu1 %v510_v19 }
  0xe1   :  { %513 = vmatpush3.bf16.msra.mxu1 %v510_v19 }
 0x126   :  { %v57_v24 = vpop.trf.xlu0 }
 0x127   :  { %v76_v26 = vrot.slane %v57_v24, %v75_v23 }
 0x129   :  { %v77_v27 = vmul.f32 %v76_v26, %v40_v25 }
 0x12b   :  { %80 = vrot.lane.b32.xlu1 %v77_v27, %s557_s8  ;;  %v78_v28 = vsel %vm32_vm1, %v77_v27, 0.0 }
 0x12c   :  { %485 = vmatprep.mubr.msk.f32.mxu1 %vm92_vm2, %v78_v28 }
 0x19d   :  { %v81_v29 = vpop.permute.xlu1 %80 }
 0x19e   :  { %v83_v30 = vsel %vm32_vm1, 0.0, %v81_v29 }
 0x19f   :  { %486 = vmatmul.mubr.msk.f32.vlgmr.msra.gmra.mrb[0].mxu1 %vm92_vm2, %v83_v30 }
 0x1a0   :  { %503 = vmatprep.mubr.msk.f32.mxu1 %vm92_vm2, %v78_v28 }
 0x272   :  { %v487_v35 = vpop.f32.mrb[0].mxu1 }
 0x273   :  { %v259_v36 = vadd.f32 %v487_v35, %v448_v34  ;;  %v253_v37 = vpop.f32.mrb[1].mxu1 }
 0x274   :  { %v254_v38 = vadd.f32 %v448_v34, %v253_v37 }
 0x275   :  { %v263_v40 = vmax.f32 %v259_v36, 0.0 }
 0x276   :  { %v262_v39 = vmax.f32 %v254_v38, 0.0 }
 0x278   :  { %496 = vmatprep.mubr.msk.f32.mxu0 %vm264_vm4, %v262_v39 }
 0x279   :  { %497 = vmatmul.mubr.msk.f32.vlgmr.msra.gmra.mrb[2].mxu0 %vm264_vm4, %v263_v40 }
 0x34c   :  { %v498_v41 = vpop.f32.mrb[2].mxu0 }
 0x34d   :  { %v337_v42 = vpop.f32.mrb[3].mxu0 }
 0x34e   :  { %v522_v43 = vpack.c.bf16 %v498_v41, %v337_v42 }
 0x350   :  { %523 = vmatprep.subr.bf16.mxu1 %v522_v43 }
 0x351   :  { %525 = vmatpush3.bf16.msra.mxu1 %v522_v43 }
 0x354   :  { %504 = vmatmul.mubr.msk.f32.vlgmr.msra.gmra.mrb[2].mxu1 %vm92_vm2, %v83_v30 }
 0x427   :  { %v505_v45 = vpop.f32.mrb[2].mxu1 }
 0x428   :  { %v425_v46 = vadd.f32 %v505_v45, %v453_v44  ;;  %v419_v47 = vpop.f32.mrb[3].mxu1 }
 0x429   :  { %v420_v48 = vadd.f32 %v453_v44, %v419_v47 }
 0x42a   :  { %429 = vst.msk [vmem:[#allocation2 + $0x8] sm:$0xff] %vm92_vm2, %v425_v46 }
 0x42b   :  { %428 = vst.msk [vmem:[#allocation2] sm:$0xff] %vm92_vm2, %v420_v48 }
 0x42c   :  { %543 = shalt.err (!%p540_p4)
}
 0x42d   :  { %s544_s19 = scalar_lea.hbm %s659_s6, 256 }
 0x42e   :  { %p545_p5 = scmp.ne.s32.totalorder %s659_s6, %s544_s19  ;;  %p548_p6 = scmp.lt.u32.totalorder %s544_s19, %s659_s6 }
 0x430   :  { %p550_p7 = pnand %p548_p6, %p545_p5 }
 0x432   :  { %553 = shalt.err (!%p550_p7)
}
 0x433   :  { %s559_s24 = smov 128  }
 0x434   :  { %441 = dma.vmem_to_hbm [thread:$0]  %s436_s16, 256, %s659_s6, [#allocation3], %s559_s24, %s559_s24, %s557_s8  }
 0x435   :  { %554 = dma.done.wait [#allocation3], 256  }
 0x436   :  { %555 = vsyncadd [#allocation3], 4294967040 }
 0x437   :  { %445 = vsyncpa [#allocation3], 1 }

</bundles_post_ra>
